<compile_context>
chip_gen: v7x
topology: tpu7x:2x2x1
jax: 0.10.0
libtpu: 0.0.40
codegen_flags: <defaults>
</compile_context>

<pallas_src>
import functools

import jax
import jax.numpy as jnp
from jax.experimental import pallas as pl
from jax.experimental.pallas import tpu as pltpu

_EPS = 1e-5
_BF16 = jnp.bfloat16
_ROW_CHUNK = 256          # matmul rows per in-kernel chunk


def _cpad(c):
    """Channel padding: lane-dense (128) for small channel counts."""
    return 128 if c < 128 else c


# ----------------------------------------------------------------------------
# Kernel 1: fused inverted-residual block
#   1x1 expand (MXU, bf16) + BN + ReLU6  -> written directly into a
#   zero-bordered VMEM spatial scratch ->
#   3x3 depthwise (VPU, 9 shifted taps) + BN + ReLU6 fused with
#   1x1 project (MXU, bf16) + BN (+ conv/identity shortcut) -> output store.
# Grid = (G, N): G = weight group (12 for the multi-scale feat blocks,
# 1 otherwise), N = batch.  All intermediates stay in VMEM, no staging copies.
# ----------------------------------------------------------------------------
def _block_kernel(x_ref, w1_ref, s1_ref, b1_ref, w2_ref, s2_ref, b2_ref,
                  w3_ref, s3_ref, b3_ref, *rest, H, W, stride, shortcut):
    if shortcut == 'conv':
        wsc_ref, ssc_ref, bsc_ref, o_ref, pad_ref = rest
    else:
        o_ref, pad_ref = rest

    Ho = (H - 1) // stride + 1
    Wo = (W - 1) // stride + 1
    P = w1_ref.shape[2]

    s1 = s1_ref[0]
    b1 = b1_ref[0]
    s2 = s2_ref[0]
    b2 = b2_ref[0]
    s3 = s3_ref[0]
    b3 = b3_ref[0]
    w1 = w1_ref[0].astype(_BF16)
    w3 = w3_ref[0].astype(_BF16)

    # ---- zero only the border rows that are not overwritten below ---------
    # (left/right zero columns are folded into the expansion stores below, so
    #  every scratch element is rewritten each grid step -> parallel-safe).
    if stride == 1:
        zrow = jnp.zeros((1, W + 2, P), jnp.float32)
        pad_ref[0:1] = zrow
        pad_ref[H + 1:H + 2] = zrow
    else:
        zrow = jnp.zeros((1, Wo + 1, P), jnp.float32)
        for p in range(4):
            pad_ref[p, 0:1] = zrow

    # ---- 1x1 expand (MXU) + BN + ReLU6, stored straight into the scratch --
    if stride == 1:
        rg = max(1, _ROW_CHUNK // W)
        for h0 in range(0, H, rg):
            h1 = min(h0 + rg, H)
            xb = x_ref[0, 0, h0 * W:h1 * W, :].astype(_BF16)
            y = jnp.dot(xb, w1, preferred_element_type=jnp.float32)
            y = jnp.clip(y * s1 + b1, 0.0, 6.0).reshape(h1 - h0, W, P)
            zc = jnp.zeros((h1 - h0, 1, P), jnp.float32)
            pad_ref[1 + h0:1 + h1] = jnp.concatenate([zc, y, zc], axis=1)
    else:
        # x rows arrive parity ordered ((pr, pc, i, j)); pad_ref:
        # (4, Ho+1, Wo+1, P), plane p = pr*2+pc, data at [p, 1+i, 1+j].
        Mp = Ho * Wo
        rg = max(1, _ROW_CHUNK // Wo)
        for p in range(4):
            for i0 in range(0, Ho, rg):
                i1 = min(i0 + rg, Ho)
                base = p * Mp + i0 * Wo
                xb = x_ref[0, 0, base:base + (i1 - i0) * Wo, :].astype(_BF16)
                y = jnp.dot(xb, w1, preferred_element_type=jnp.float32)
                y = jnp.clip(y * s1 + b1, 0.0, 6.0).reshape(i1 - i0, Wo, P)
                zc = jnp.zeros((i1 - i0, 1, P), jnp.float32)
                pad_ref[p, 1 + i0:1 + i1] = jnp.concatenate([zc, y], axis=1)

    # ---- depthwise 3x3 (VPU) + BN + ReLU6 fused with 1x1 project (MXU) ----
    w2t = [w2_ref[0, t] for t in range(9)]            # each (1, P)
    if shortcut == 'conv':
        wsc = wsc_ref[0].astype(_BF16)
        ssc = ssc_ref[0]
        bsc = bsc_ref[0]
    # stride-2: tap offset d -> (parity plane component, slice offset)
    pmap = {0: (1, 0), 1: (0, 1), 2: (1, 1)}
    rg = max(1, _ROW_CHUNK // Wo)
    for r0 in range(0, Ho, rg):
        r1 = min(r0 + rg, Ho)
        acc = None
        t = 0
        for dy in range(3):
            for dx in range(3):
                if stride == 1:
                    tap = pad_ref[dy + r0:dy + r1, dx:dx + W, :]
                else:
                    pr, ay = pmap[dy]
                    pc, ax = pmap[dx]
                    tap = pad_ref[pr * 2 + pc, ay + r0:ay + r1, ax:ax + Wo, :]
                term = tap * w2t[t]
                acc = term if acc is None else acc + term
                t += 1
        dwc = jnp.clip(acc * s2 + b2, 0.0, 6.0)        # (r1-r0, Wo, P)
        db = dwc.reshape((r1 - r0) * Wo, P).astype(_BF16)
        y = jnp.dot(db, w3, preferred_element_type=jnp.float32) * s3 + b3
        if shortcut == 'conv':
            xb = x_ref[0, 0, r0 * Wo:r1 * Wo, :].astype(_BF16)
            y = y + (jnp.dot(xb, wsc, preferred_element_type=jnp.float32)
                     * ssc + bsc)
        elif shortcut == 'identity':
            y = y + x_ref[0, 0, r0 * Wo:r1 * Wo, :]
        o_ref[0, 0, r0 * Wo:r1 * Wo, :] = y


@functools.lru_cache(maxsize=None)
def _get_block_call(G, N, H, W, Cin, P, Cout, stride, shortcut):
    Ho = (H - 1) // stride + 1
    Wo = (W - 1) // stride + 1
    Mi, Mo = H * W, Ho * Wo
    pad_shape = ((H + 2, W + 2, P) if stride == 1
                 else (4, Ho + 1, Wo + 1, P))

    in_specs = [
        pl.BlockSpec((1, 1, Mi, Cin), lambda g, n: (g, n, 0, 0)),
        pl.BlockSpec((1, Cin, P), lambda g, n: (g, 0, 0)),
        pl.BlockSpec((1, 1, P), lambda g, n: (g, 0, 0)),
        pl.BlockSpec((1, 1, P), lambda g, n: (g, 0, 0)),
        pl.BlockSpec((1, 9, 1, P), lambda g, n: (g, 0, 0, 0)),
        pl.BlockSpec((1, 1, P), lambda g, n: (g, 0, 0)),
        pl.BlockSpec((1, 1, P), lambda g, n: (g, 0, 0)),
        pl.BlockSpec((1, P, Cout), lambda g, n: (g, 0, 0)),
        pl.BlockSpec((1, 1, Cout), lambda g, n: (g, 0, 0)),
        pl.BlockSpec((1, 1, Cout), lambda g, n: (g, 0, 0)),
    ]
    if shortcut == 'conv':
        in_specs += [pl.BlockSpec((1, Cin, Cout), lambda g, n: (g, 0, 0)),
                     pl.BlockSpec((1, 1, Cout), lambda g, n: (g, 0, 0)),
                     pl.BlockSpec((1, 1, Cout), lambda g, n: (g, 0, 0))]

    kern = functools.partial(_block_kernel, H=H, W=W, stride=stride,
                             shortcut=shortcut)
    return pl.pallas_call(
        kern,
        grid=(G, N),
        out_shape=jax.ShapeDtypeStruct((G, N, Mo, Cout), jnp.float32),
        in_specs=in_specs,
        out_specs=pl.BlockSpec((1, 1, Mo, Cout), lambda g, n: (g, n, 0, 0)),
        scratch_shapes=[pltpu.VMEM(pad_shape, jnp.float32)],
        compiler_params=pltpu.CompilerParams(
            dimension_semantics=("parallel", "parallel")),
    )


def _parity_rows(x):
    """(..., H, W, C) -> (..., H*W, C), rows ordered ((pr, pc, i, j))."""
    *lead, H, W, C = x.shape
    Ho, Wo = H // 2, W // 2
    nl = len(lead)
    x = x.reshape(*lead, Ho, 2, Wo, 2, C)
    perm = tuple(range(nl)) + (nl + 1, nl + 3, nl, nl + 2, nl + 4)
    return x.transpose(perm).reshape(*lead, H * W, C)


def block_forward(p, x):
    """Fused Block: x (N, H, W, Cin_pad) -> (N, Ho, Wo, Cout_pad)."""
    N, H, W, Cin = x.shape
    stride = p['stride']
    shortcut = p['shortcut']
    P = p['w1'].shape[2]
    Cout = p['w3'].shape[2]
    Ho = (H - 1) // stride + 1
    Wo = (W - 1) // stride + 1

    if stride == 1:
        x_rows = x.reshape(1, N, H * W, Cin)
    else:
        assert H % 2 == 0 and W % 2 == 0
        x_rows = _parity_rows(x).reshape(1, N, H * W, Cin)

    inputs = [x_rows, p['w1'], p['s1'], p['b1'], p['w2'], p['s2'], p['b2'],
              p['w3'], p['s3'], p['b3']]
    if shortcut == 'conv':
        inputs += [p['sc_w'], p['sc_s'], p['sc_b']]
    call = _get_block_call(1, N, H, W, Cin, P, Cout, stride, shortcut)
    return call(*inputs).reshape(N, Ho, Wo, Cout)


def feat_blocks_forward(p, x):
    """All multi-scale 'feat' blocks in ONE pallas_call.

    x: (G, N, H, W, 128) branch inputs (channel zero-padded).  Per-branch
    weights are stacked on the leading G axis (planes zero-padded to a common
    width) and selected per grid step by the BlockSpec index_map.
    """
    G, N, H, W, Cin = x.shape
    P = p['w1'].shape[2]
    Cout = p['w3'].shape[2]
    Ho, Wo = H // 2, W // 2
    x_rows = _parity_rows(x)                       # (G, N, H*W, Cin)
    call = _get_block_call(G, N, H, W, Cin, P, Cout, 2, 'none')
    out = call(x_rows, p['w1'], p['s1'], p['b1'], p['w2'], p['s2'], p['b2'],
               p['w3'], p['s3'], p['b3'])
    return out.reshape(G, N, Ho, Wo, Cout)


def _slice_feat_branch(p, idx):
    q = {'stride': 2, 'shortcut': 'none'}
    for k in ('w1', 's1', 'b1', 'w2', 's2', 'b2', 'w3', 's3', 'b3'):
        q[k] = p[k][idx:idx + 1]
    return q


# ----------------------------------------------------------------------------
# Kernel 2: M-tiled matmul + folded BN (+ReLU6)   (used for the stem conv)
# ----------------------------------------------------------------------------
def _matmul_bn_kernel(x_ref, w_ref, s_ref, b_ref, o_ref, *, act):
    y = jnp.dot(x_ref[...].astype(_BF16), w_ref[...],
                preferred_element_type=jnp.float32)
    y = y * s_ref[...] + b_ref[...]
    if act:
        y = jnp.clip(y, 0.0, 6.0)
    o_ref[...] = y


@functools.lru_cache(maxsize=None)
def _get_matmul_bn_call(M, K, Nout, act, tm):
    kern = functools.partial(_matmul_bn_kernel, act=act)
    return pl.pallas_call(
        kern,
        grid=(M // tm,),
        out_shape=jax.ShapeDtypeStruct((M, Nout), jnp.float32),
        in_specs=[pl.BlockSpec((tm, K), lambda i: (i, 0)),
                  pl.BlockSpec((K, Nout), lambda i: (0, 0)),
                  pl.BlockSpec((1, Nout), lambda i: (0, 0)),
                  pl.BlockSpec((1, Nout), lambda i: (0, 0))],
        out_specs=pl.BlockSpec((tm, Nout), lambda i: (i, 0)),
        compiler_params=pltpu.CompilerParams(
            dimension_semantics=("parallel",)),
    )


def matmul_bn(x, w, scale, bias, act=False, block_m=512):
    M, K = x.shape
    Nout = w.shape[1]
    tm = min(block_m, M)
    while M % tm:
        tm //= 2
    tm = max(tm, 1)
    call = _get_matmul_bn_call(M, K, Nout, act, tm)
    return call(x, w, scale.reshape(1, Nout), bias.reshape(1, Nout))


def conv3x3_bn_relu6(x, w_hwio, scale, bias):
    """Stem dense 3x3 conv (stride 1, pad 1) via im2col + Pallas matmul+BN."""
    N, H, W, Cin = x.shape
    Cout = w_hwio.shape[-1]                       # padded to 128 lanes
    xp = jnp.pad(x, ((0, 0), (1, 1), (1, 1), (0, 0)))
    cols = [xp[:, dy:dy + H, dx:dx + W, :] for dy in range(3) for dx in range(3)]
    xc = jnp.concatenate(cols, axis=-1).reshape(N * H * W, 9 * Cin)
    K = 9 * Cin
    Kp = ((K + 7) // 8) * 8                       # 27 -> 32 aligned contraction
    xc = jnp.pad(xc, ((0, 0), (0, Kp - K)))
    wm = jnp.pad(w_hwio.reshape(K, Cout), ((0, Kp - K), (0, 0))).astype(_BF16)
    y = matmul_bn(xc, wm, scale, bias, act=True)
    return y.reshape(N, H, W, Cout)


# ----------------------------------------------------------------------------
# Kernel 3: fused classifier head (conv2 1x1 + BN + ReLU6 + 2x2 avgpool + FC)
# One grid step over ALL images; rows arrive position-major so the pooling is
# a sum of contiguous row blocks.
# ----------------------------------------------------------------------------
def _classifier_kernel(x_ref, w_ref, s_ref, b_ref, lw_ref, lb_ref, o_ref,
                       *, n_img):
    s = s_ref[...]
    b = b_ref[...]
    w = w_ref[...]
    pooled = None
    for pos in range(4):                          # 2x2 avg-pool positions
        xb = x_ref[pos * n_img:(pos + 1) * n_img, :].astype(_BF16)
        y = jnp.dot(xb, w, preferred_element_type=jnp.float32)
        y = jnp.clip(y * s + b, 0.0, 6.0)
        pooled = y if pooled is None else pooled + y
    pooled = pooled * 0.25
    logits = jnp.dot(pooled.astype(_BF16), lw_ref[...],
                     preferred_element_type=jnp.float32) + lb_ref[...]
    o_ref[...] = logits


@functools.lru_cache(maxsize=None)
def _get_classifier_call(n_img, C, Cmid, ncp):
    kern = functools.partial(_classifier_kernel, n_img=n_img)
    rows = 4 * n_img
    return pl.pallas_call(
        kern,
        grid=(1,),
        out_shape=jax.ShapeDtypeStruct((n_img, ncp), jnp.float32),
        in_specs=[pl.BlockSpec((rows, C), lambda i: (0, 0)),
                  pl.BlockSpec((C, Cmid), lambda i: (0, 0)),
                  pl.BlockSpec((1, Cmid), lambda i: (0, 0)),
                  pl.BlockSpec((1, Cmid), lambda i: (0, 0)),
                  pl.BlockSpec((Cmid, ncp), lambda i: (0, 0)),
                  pl.BlockSpec((1, ncp), lambda i: (0, 0))],
        out_specs=pl.BlockSpec((n_img, ncp), lambda i: (0, 0)),
    )


def classifier_head(params, feat):
    N, H, W, C = feat.shape
    assert H == 2 and W == 2, "F.avg_pool2d(., 2) head expects a 2x2 map"
    # position-major rows: row = pos * N + image
    x = feat.reshape(N, H * W, C).transpose(1, 0, 2).reshape(H * W * N, C)
    ncp = params['linear_w'].shape[1]
    call = _get_classifier_call(N, C, params['conv2_w'].shape[1], ncp)
    out = call(x, params['conv2_w'], params['bn2_s'], params['bn2_b'],
               params['linear_w'], params['linear_b'])
    return out[:, :params['num_classes']]


# ----------------------------------------------------------------------------
# Deterministic parameter construction (weights padded once at build time)
# ----------------------------------------------------------------------------
class KeyGen:
    def __init__(self, key):
        self.key = key
        self.i = 0

    def __call__(self):
        self.i += 1
        return jax.random.fold_in(self.key, self.i)


def _bn_fold(key, c):
    k1, k2, k3, k4 = jax.random.split(key, 4)
    gamma = 1.0 + 0.1 * jax.random.normal(k1, (c,), jnp.float32)
    beta = 0.1 * jax.random.normal(k2, (c,), jnp.float32)
    mean = 0.1 * jax.random.normal(k3, (c,), jnp.float32)
    var = 0.5 + jnp.abs(0.1 * jax.random.normal(k4, (c,), jnp.float32))
    scale = gamma / jnp.sqrt(var + _EPS)
    bias = beta - mean * scale
    return scale, bias


def _pad1(v, n):
    return jnp.pad(v, (0, n - v.shape[0]))


def build_block_params(kg, in_planes, out_planes, expansion, stride, flag):
    planes = expansion * in_planes
    cin_p = _cpad(in_planes)
    cout_p = _cpad(out_planes)
    w1 = 0.1 * jax.random.normal(kg(), (in_planes, planes), jnp.float32)
    s1, b1 = _bn_fold(kg(), planes)
    w2 = 0.1 * jax.random.normal(kg(), (9, planes), jnp.float32)
    s2, b2 = _bn_fold(kg(), planes)
    w3 = 0.1 * jax.random.normal(kg(), (planes, out_planes), jnp.float32)
    s3, b3 = _bn_fold(kg(), out_planes)

    p = {
        'stride': stride,
        'w1': jnp.pad(w1, ((0, cin_p - in_planes), (0, 0))).astype(_BF16)[None],
        's1': s1.reshape(1, 1, planes),
        'b1': b1.reshape(1, 1, planes),
        'w2': w2.reshape(1, 9, 1, planes),
        's2': s2.reshape(1, 1, planes),
        'b2': b2.reshape(1, 1, planes),
        'w3': jnp.pad(w3, ((0, 0), (0, cout_p - out_planes))).astype(_BF16)[None],
        's3': _pad1(s3, cout_p).reshape(1, 1, cout_p),
        'b3': _pad1(b3, cout_p).reshape(1, 1, cout_p),
    }
    has_sc_conv = ((flag == 0 and stride == 1 and in_planes != out_planes)
                   or flag == 1)
    if stride != 1:
        p['shortcut'] = 'none'                    # shortcut unused at stride 2
    elif has_sc_conv:
        p['shortcut'] = 'conv'
        wsc = 0.1 * jax.random.normal(kg(), (in_planes, out_planes), jnp.float32)
        ss, sb = _bn_fold(kg(), out_planes)
        p['sc_w'] = jnp.pad(wsc, ((0, cin_p - in_planes),
                                  (0, cout_p - out_planes))).astype(_BF16)[None]
        p['sc_s'] = _pad1(ss, cout_p).reshape(1, 1, cout_p)
        p['sc_b'] = _pad1(sb, cout_p).reshape(1, 1, cout_p)
    else:
        p['shortcut'] = 'identity'
    return p


def build_feat_stacked_params(kg):
    """Block(2*(i+1), 32, expansion=6, stride=2, flag=1) for i=0..11, padded
    to a common (Cin=128, planes=144, Cout=128) and stacked on a branch axis
    so all 12 branches run in a single pallas_call."""
    G = 12
    pmax = 6 * 24
    cin_p = 128
    cout_p = _cpad(32)
    acc = {k: [] for k in ('w1', 's1', 'b1', 'w2', 's2', 'b2', 'w3', 's3', 'b3')}
    for i in range(G):
        cin = 2 * (i + 1)
        planes = 6 * cin
        w1 = 0.1 * jax.random.normal(kg(), (cin, planes), jnp.float32)
        s1, b1 = _bn_fold(kg(), planes)
        w2 = 0.1 * jax.random.normal(kg(), (9, planes), jnp.float32)
        s2, b2 = _bn_fold(kg(), planes)
        w3 = 0.1 * jax.random.normal(kg(), (planes, 32), jnp.float32)
        s3, b3 = _bn_fold(kg(), 32)
        # (flag==1 blocks own a shortcut conv in PyTorch, but stride==2 means
        #  it is never applied, so its weights are not materialized.)
        acc['w1'].append(jnp.pad(w1, ((0, cin_p - cin), (0, pmax - planes))))
        acc['s1'].append(_pad1(s1, pmax))
        acc['b1'].append(_pad1(b1, pmax))
        acc['w2'].append(jnp.pad(w2, ((0, 0), (0, pmax - planes))))
        acc['s2'].append(_pad1(s2, pmax))
        acc['b2'].append(_pad1(b2, pmax))
        acc['w3'].append(jnp.pad(w3, ((0, pmax - planes), (0, cout_p - 32))))
        acc['s3'].append(_pad1(s3, cout_p))
        acc['b3'].append(_pad1(b3, cout_p))
    return {
        'stride': 2,
        'shortcut': 'none',
        'w1': jnp.stack(acc['w1']).astype(_BF16),
        's1': jnp.stack(acc['s1']).reshape(G, 1, pmax),
        'b1': jnp.stack(acc['b1']).reshape(G, 1, pmax),
        'w2': jnp.stack(acc['w2']).reshape(G, 9, 1, pmax),
        's2': jnp.stack(acc['s2']).reshape(G, 1, pmax),
        'b2': jnp.stack(acc['b2']).reshape(G, 1, pmax),
        'w3': jnp.stack(acc['w3']).astype(_BF16),
        's3': jnp.stack(acc['s3']).reshape(G, 1, cout_p),
        'b3': jnp.stack(acc['b3']).reshape(G, 1, cout_p),
    }


def build_params(key, num_classes=10):
    kg = KeyGen(key)
    conv1 = 0.1 * jax.random.normal(kg(), (3, 3, 3, 32), jnp.float32)
    s1, b1 = _bn_fold(kg(), 32)
    cstem = _cpad(32)
    params = {
        'conv1_w': jnp.pad(conv1, ((0, 0), (0, 0), (0, 0), (0, cstem - 32))),
        'bn1_s': _pad1(s1, cstem),
        'bn1_b': _pad1(b1, cstem),
    }

    def make_stage(cfg, in_planes, flag):
        blocks = []
        for expansion, out_planes, num_blocks, stride in cfg:
            strides = [stride] + [1] * (num_blocks - 1)
            for s in strides:
                blocks.append(build_block_params(kg, in_planes, out_planes,
                                                 expansion, s, flag))
                in_planes = out_planes
        return blocks

    params['head'] = make_stage([(1, 16, 1, 1), (6, 24, 2, 2)], 32, 0)
    params['feat'] = build_feat_stacked_params(kg)
    params['tail'] = make_stage(
        [(6, 32, 2, 1), (6, 64, 4, 2), (6, 96, 3, 1), (6, 160, 3, 2),
         (6, 320, 1, 1)], 32, 0)
    params['conv2_w'] = (0.1 * jax.random.normal(kg(), (320, 1280),
                                                 jnp.float32)).astype(_BF16)
    s2, b2 = _bn_fold(kg(), 1280)
    params['bn2_s'] = s2.reshape(1, 1280)
    params['bn2_b'] = b2.reshape(1, 1280)
    lw = 0.1 * jax.random.normal(kg(), (1280, num_classes), jnp.float32)
    lb = 0.1 * jax.random.normal(kg(), (num_classes,), jnp.float32)
    ncp = _cpad(num_classes)                      # lane-dense classifier output
    params['linear_w'] = jnp.pad(lw, ((0, 0), (0, ncp - num_classes))).astype(_BF16)
    params['linear_b'] = _pad1(lb, ncp).reshape(1, ncp)
    params['num_classes'] = num_classes
    return params


# ----------------------------------------------------------------------------
# Model forward (matches PyTorch Block / MobileNetV2_MS_Original semantics)
# ----------------------------------------------------------------------------
_INDEX = [7, 11, 2, 0, 3, 9, 1, 5, 10, 4, 6, 8]
_ORDERS = [
    [0],
    [0, 1],
    [2, 0, 1],
    [3, 2, 0, 1],
    [3, 2, 4, 0, 1],
    [3, 2, 4, 0, 5, 1],
    [3, 6, 2, 4, 0, 5, 1],
    [3, 6, 2, 4, 7, 0, 5, 1],
    [3, 6, 2, 4, 7, 0, 5, 8, 1],
    [3, 6, 2, 4, 9, 7, 0, 5, 8, 1],
    [3, 6, 2, 4, 9, 7, 10, 0, 5, 8, 1],
    [3, 6, 2, 4, 9, 7, 10, 0, 11, 5, 8, 1],
]


def _stem_and_head(params, x_nchw):
    xh = jnp.transpose(x_nchw, (0, 2, 3, 1))
    out = conv3x3_bn_relu6(xh, params['conv1_w'], params['bn1_s'],
                           params['bn1_b'])
    for p in params['head']:
        out = block_forward(p, out)
    return out                                    # (N, 16, 16, 128); 24 real


def forward(params, x=None, flag=1, data=None):
    if flag == 2:
        feat = _stem_and_head(params, x)[..., :24]
        return jnp.transpose(feat, (0, 3, 1, 2))           # NCHW like PyTorch

    if flag == 0:
        out = jnp.transpose(data, (0, 2, 3, 1))             # (N, 16, 16, 24)
        out = jnp.pad(out, ((0, 0), (0, 0), (0, 0), (0, 128 - out.shape[-1])))
        q = _slice_feat_branch(params['feat'], 11)
        out = feat_blocks_forward(q, out[None])[0]           # (N, 8, 8, 128)
        for p in params['tail']:
            out = block_forward(p, out)
        return classifier_head(params, out)

    if flag == 1:
        feat = _stem_and_head(params, x)[..., :24]           # (N, 16, 16, 24)
        N = feat.shape[0]
        chunks = [feat[..., 2 * i:2 * i + 2] for i in range(12)]  # split(2,dim=1)
        feat_sort = [chunks[i] for i in _INDEX]
        branches = []
        for order in _ORDERS:
            f = jnp.concatenate([feat_sort[j] for j in order], axis=-1)
            branches.append(jnp.pad(
                f, ((0, 0), (0, 0), (0, 0), (0, 128 - f.shape[-1]))))
        xb = jnp.stack(branches, axis=0)                     # (12, N, 16, 16, 128)
        bf = feat_blocks_forward(params['feat'], xb)         # (12, N, 8, 8, 128)
        big = bf.reshape(12 * N, 8, 8, bf.shape[-1])
        for p in params['tail']:                             # shared tail once
            big = block_forward(p, big)
        logits = classifier_head(params, big)                # (12N, classes)
        return [logits[i * N:(i + 1) * N] for i in range(12)]

    raise ValueError("flag must be 0, 1 or 2")


# ----------------------------------------------------------------------------
if __name__ == "__main__":
    root = jax.random.PRNGKey(0)
    params = build_params(jax.random.fold_in(root, 1))

    kx, kd = jax.random.split(jax.random.fold_in(root, 2))
    # CIFAR-style input (NCHW, matching PyTorch): 32x32 is the smallest spatial
    # size that keeps F.avg_pool2d(., 2) valid at the end of the network.
    x = jax.random.normal(kx, (2, 3, 32, 32), jnp.float32)
    # `data` for flag==0 has the shape of feat_list[11]: (N, 24, 16, 16).
    data = jax.random.normal(kd, (2, 24, 16, 16), jnp.float32)

    # flag == 2: stem + head feature extractor
    feat = jax.block_until_ready(forward(params, x=x, flag=2))
    assert feat.shape == (2, 24, 16, 16), feat.shape

    # flag == 0: layers_feat[11] + full tail + conv2/bn2 + avgpool + linear
    logits0 = jax.block_until_ready(forward(params, data=data, flag=0))
    assert logits0.shape == (2, 10), logits0.shape

    # flag == 1: 12 multi-scale branches; all branch feat blocks in one
    # pallas_call, shared tail + classifier on the batched 12x rows.
    out_list = jax.block_until_ready(forward(params, x=x, flag=1))
    assert len(out_list) == 12 and all(o.shape == (2, 10) for o in out_list)

    print("KERNEL_OK")
</pallas_src>

<mosaic_0001>
module attributes {stable_mosaic.version = 11 : i64} {
  func.func @_matmul_bn_kernel(%arg0: i32, %arg1: memref<512x32xf32, #tpu.memory_space<vmem>>, %arg2: memref<32x128xbf16, #tpu.memory_space<vmem>>, %arg3: memref<1x128xf32, #tpu.memory_space<vmem>>, %arg4: memref<1x128xf32, #tpu.memory_space<vmem>>, %arg5: memref<512x128xf32, #tpu.memory_space<vmem>>) attributes {dimension_semantics = [#tpu.dimension_semantics<parallel>], iteration_bounds = array<i64: 4>, scalar_prefetch = 0 : i64, scratch_operands = 0 : i64, tpu.core_type = #tpu.core_type<tc>, window_params = [{transform_indices = @transform_0, window_bounds = array<i64: 512, 32>}, {pipeline_mode = #tpu.pipeline_mode<synchronous>, transform_indices = @transform_1, window_bounds = array<i64: 32, 128>}, {pipeline_mode = #tpu.pipeline_mode<synchronous>, transform_indices = @transform_2, window_bounds = array<i64: 1, 128>}, {pipeline_mode = #tpu.pipeline_mode<synchronous>, transform_indices = @transform_3, window_bounds = array<i64: 1, 128>}, {transform_indices = @transform_4, window_bounds = array<i64: 512, 128>}]} {
    %c0 = arith.constant 0 : index
    %c0_0 = arith.constant 0 : index
    %0 = vector.load %arg1[%c0, %c0_0] : memref<512x32xf32, #tpu.memory_space<vmem>>, vector<512x32xf32>
    %1 = arith.truncf %0 : vector<512x32xf32> to vector<512x32xbf16>
    %c0_1 = arith.constant 0 : index
    %c0_2 = arith.constant 0 : index
    %2 = vector.load %arg2[%c0_1, %c0_2] : memref<32x128xbf16, #tpu.memory_space<vmem>>, vector<32x128xbf16>
    %cst = arith.constant dense<0.000000e+00> : vector<512x128xf32>
    %3 = tpu.matmul %1, %2, %cst {dimension_numbers = #tpu.dot_dimension_numbers<[1], [0], [0], [1], [0, 0, 1, 1], [], []>} : vector<512x32xbf16>, vector<32x128xbf16>, vector<512x128xf32> -> vector<512x128xf32>
    %c0_3 = arith.constant 0 : index
    %c0_4 = arith.constant 0 : index
    %4 = vector.load %arg3[%c0_3, %c0_4] : memref<1x128xf32, #tpu.memory_space<vmem>>, vector<1x128xf32>
    %5 = vector.broadcast %4 : vector<1x128xf32> to vector<512x128xf32>
    %6 = arith.mulf %3, %5 : vector<512x128xf32>
    %c0_5 = arith.constant 0 : index
    %c0_6 = arith.constant 0 : index
    %7 = vector.load %arg4[%c0_5, %c0_6] : memref<1x128xf32, #tpu.memory_space<vmem>>, vector<1x128xf32>
    %8 = vector.broadcast %7 : vector<1x128xf32> to vector<512x128xf32>
    %9 = arith.addf %6, %8 : vector<512x128xf32>
    %cst_7 = arith.constant 0.000000e+00 : f32
    %cst_8 = arith.constant 6.000000e+00 : f32
    %10 = vector.broadcast %cst_7 : f32 to vector<512x128xf32>
    %11 = arith.maximumf %10, %9 : vector<512x128xf32>
    %12 = vector.broadcast %cst_8 : f32 to vector<512x128xf32>
    %13 = arith.minimumf %12, %11 : vector<512x128xf32>
    %c0_9 = arith.constant 0 : index
    %c0_10 = arith.constant 0 : index
    %14 = vector.load %arg5[%c0_9, %c0_10] : memref<512x128xf32, #tpu.memory_space<vmem>>, vector<512x128xf32>
    tpu.vector_store %arg5[%c0_9, %c0_10], %13 {strides = array<i32>} : memref<512x128xf32, #tpu.memory_space<vmem>>, vector<512x128xf32>,
    return
  }
  func.func @transform_0(%arg0: i32) -> (i32, i32) {
    %c0_i32 = arith.constant 0 : i32
    %c0_i32_0 = arith.constant 0 : i32
    return %arg0, %c0_i32 : i32, i32
  }
  func.func @transform_1(%arg0: i32) -> (i32, i32) {
    %c0_i32 = arith.constant 0 : i32
    %c0_i32_0 = arith.constant 0 : i32
    %c0_i32_1 = arith.constant 0 : i32
    return %c0_i32, %c0_i32_0 : i32, i32
  }
  func.func @transform_2(%arg0: i32) -> (i32, i32) {
    %c0_i32 = arith.constant 0 : i32
    %c0_i32_0 = arith.constant 0 : i32
    %c0_i32_1 = arith.constant 0 : i32
    return %c0_i32, %c0_i32_0 : i32, i32
  }
  func.func @transform_3(%arg0: i32) -> (i32, i32) {
    %c0_i32 = arith.constant 0 : i32
    %c0_i32_0 = arith.constant 0 : i32
    %c0_i32_1 = arith.constant 0 : i32
    return %c0_i32, %c0_i32_0 : i32, i32
  }
  func.func @transform_4(%arg0: i32) -> (i32, i32) {
    %c0_i32 = arith.constant 0 : i32
    %c0_i32_0 = arith.constant 0 : i32
    return %arg0, %c0_i32 : i32, i32
  }
}

</mosaic_0001>

<bundles_post_ra>
// kernel: tpu_custom_call.1
= control target key start
LH: loop header
LB: loop body
LE: loop exit
PB: predicated region body
PF: predicated region fallthrough
CT: control target
= control target key end

     0   :  { %9 = vsyncpa [#allocation3], 0  ;;  %s1813_s0 = inlined_call_operand.vmem [shape: f32[2048,32], index: 0, kind: input, shape index: {}]   ;;  %s1814_s1 = inlined_call_operand.vmem [shape: bf16[32,128], index: 1, kind: input, shape index: {}]   ;;  %s1815_s2 = inlined_call_operand.vmem [shape: f32[1,128], index: 2, kind: input, shape index: {}]   ;;  %s1816_s3 = inlined_call_operand.vmem [shape: f32[1,128], index: 3, kind: input, shape index: {}]   ;;  %s1817_s4 = inlined_call_operand.hbm [shape: f32[2048,128], index: 4, kind: output, shape index: {}]  }
   0x1   :  { %11 = vsyncpa [#allocation3 + $0x1], 0  ;;  %s1398_s15 = smov 0   ;;  %s1400_s16 = smov 0  }
   0x2   :  { %s1402_s17 = smov 0   ;;  %s1404_s18 = smov 0  }
   0x3 LB: > { %s1419_s19 = sadd.s32 4294967295, %s1368_s18   ;;  %s1108_s20 = sadd.s32 4294967294, %s1368_s18   ;;  %s1368_s18 = sphi %s1404_s18, %s1823_s18   ;;  %s1364_s17 = sphi %s1402_s17, %s1822_s17   ;;  %s1360_s16 = sphi %s1400_s16, %s1821_s16   ;;  %s1356_s15 = sphi %s1398_s15, %s1820_s15  }
   0x4   : > { %s1423_s21 = sadd.s32 1, %s1368_s18   ;;  %s113_s22 = sadd.s32 1, %s1364_s17 }
   0x5   : > { %s110_s23 = ssub.s32 %s1368_s18, %s1423_s21  ;;  %p123_p0 = scmp.ne.s32.totalorder %s1364_s17, %s1360_s16 }
   0x6   : > { %p111_p1 = scmp.eq.s32.totalorder %s110_s23, 0  ;;  %p124_p2 = scmp.eq.s32.totalorder %s1419_s19, 3 }
   0x7   : > { %p129_p3 = scmp.ne.s32.totalorder %s1360_s16, %s1356_s15  ;;  %p130_p4 = scmp.eq.s32.totalorder %s1108_s20, 3 }
   0x8   : > { %s1434_s24 = scalar_select %p111_p1, %s1364_s17, %s113_s22  }
   0x9   : > { %p1436_p5 = por %p124_p2, %p123_p0  ;;  %p1440_p6 = por %p130_p4, %p129_p3 }
   0xa   : > { %p1111_p7 = scmp.ge.s32.totalorder %s1368_s18, 1  ;;  %p166_p8 = scmp.lt.s32.totalorder %s1368_s18, 5 }
   0xc   : > { %p167_p9 = pnand %p1111_p7, %p166_p8 }
   0xd   : > { %v1304_v0 = vld [vmem:[%s1814_s1] sm:$0xff] (!%p167_p9)   ;;  %s1113_s29 = sshll.u32 (!%p167_p9), %s1419_s19, 6  ;;  %v1305_v1 = vld [vmem:[%s1814_s1 + $0x8] sm:$0xff] (!%p167_p9)   ;;  %vm312_vm0 = vcmask (!%p167_p9), 261120   ;;  %s189_s12 = sand.u32 (!%p167_p9), 1, %s1360_s16  }
   0xe   : > { %170 = sbr.rel (%p167_p9) target bundleno = 324 (0x144), region = 36  ;;  %p193_p10 = scmp.lt.s32.totalorder (!%p167_p9), %s1113_s29, 255  ;;  %1191 = vmatprep.subr.bf16.mxu0 (!%p167_p9), %v1304_v0  ;;  %1259 = vmatprep.subr.bf16.mxu1 (!%p167_p9), %v1304_v0 }
   0xf   : > { %1192 = vmatpush3.bf16.msra.mxu0 (!%p167_p9), %v1304_v0  ;;  %1261 = vmatpush3.bf16.msra.mxu1 (!%p167_p9), %v1304_v0  ;;  %s1112_s20 = sshll.u32 (!%p167_p9), %s189_s12, 9  ;;  %s1156_s23 = sshll.u32 (!%p167_p9), %s1419_s19, 13 }
  0x10   : > { %1193 = vmatprep.subr.bf16.mxu0 (!%p167_p9), %v1305_v1  ;;  %1260 = vmatprep.subr.bf16.mxu1 (!%p167_p9), %v1305_v1  ;;  %s1583_s22 = scalar_lea.vmem (!%p167_p9), [#allocation2], %s1112_s20  ;;  %s1772_s30 = scalar_lea.sflag (!%p167_p9), [#allocation3], %s189_s12 }
  0x11   : > { %s1046_s27 = sshll.u32 (!%p167_p9), %s1583_s22, 4  ;;  %s1763_s27 = int_to_ptr.vmem [resolvable:$true] %s1046_s27 }
  0x12   : > { %s1306_s5 = scalar_lea.vmem (!%p167_p9), %s1763_s27, 8192 }
  0x13   : > { %1194 = vmatpush3.bf16.msra.mxu0 (!%p167_p9), %v1305_v1  ;;  %1262 = vmatpush3.bf16.msra.mxu1 (!%p167_p9), %v1305_v1  ;;  %p1307_p11 = scmp.ne.s32.totalorder (!%p167_p9), %s1763_s27, %s1306_s5 }
  0x15   : > { %s1825_s29 = smov (!%p193_p10, %s1113_s29), 255  ;;  %p1308_p12 = pnand %p1307_p11, %p1436_p5 }
  0x16   : > { %s1114_s6 = sshll.u32 %s1825_s29, 3  ;;  %s1761_s29 = scalar_lea.hbm %s1817_s4, %s1156_s23 }
  0x17   : > { %s1456_s9 = scalar_lea.vmem %s1813_s0, %s1114_s6  ;;  %p1309_p13 = pneg %p1308_p12 }
  0x18   : > { %v200_v2 = vld [vmem:[%s1456_s9] sm:$0xff]  ;;  %v201_v3 = vld [vmem:[%s1456_s9 + $0x8] sm:$0xff]  ;;  %v202_v7 = vld [vmem:[%s1456_s9 + $0x10] sm:$0xff]  ;;  %s1370_s6 = smov [#allocation2]  }
  0x19   : > { %v232_v4 = vld [vmem:[%s1456_s9 + $0x100] sm:$0xff]  ;;  %v264_v5 = vpack.c.bf16 %v201_v3, %v200_v2  ;;  %v233_v6 = vld [vmem:[%s1456_s9 + $0x108] sm:$0xff]  ;;  %v203_v8 = vld [vmem:[%s1456_s9 + $0x18] sm:$0xff]  ;;  %s1310_s7 = sshll.u32 %s1370_s6, 4  ;;  %s1311_s7 = int_to_ptr.vmem [resolvable:$false] %s1310_s7 }
  0x1a   : > { %v280_v9 = vpack.c.bf16 %v233_v6, %v232_v4  ;;  %v265_v10 = vpack.c.bf16 %v203_v8, %v202_v7  ;;  %v234_v11 = vld [vmem:[%s1456_s9 + $0x110] sm:$0xff]  ;;  %v235_v12 = vld [vmem:[%s1456_s9 + $0x118] sm:$0xff]  ;;  %v204_v13 = vld [vmem:[%s1456_s9 + $0x20] sm:$0xff]  ;;  %s1312_s8 = scalar_lea.vmem %s1311_s7, 16384  ;;  %p1313_p0 = scmp.lt.s32.totalorder %s1763_s27, %s1311_s7 }
  0x1b   : > { %1195 = vmatprep.mubr.msk.bf16.mxu0 %vm312_vm0, %v264_v5  ;;  %v281_v14 = vpack.c.bf16 %v235_v12, %v234_v11  ;;  %v205_v15 = vld [vmem:[%s1456_s9 + $0x28] sm:$0xff]  ;;  %v236_v16 = vld [vmem:[%s1456_s9 + $0x120] sm:$0xff]  ;;  %v206_v20 = vld [vmem:[%s1456_s9 + $0x30] sm:$0xff]  ;;  %p1314_p1 = scmp.lt.s32.totalorder %s1312_s8, %s1306_s5 }
  0x1c   : > { %v237_v17 = vld [vmem:[%s1456_s9 + $0x128] sm:$0xff]  ;;  %1227 = vmatprep.mubr.msk.bf16.mxu1 %vm312_vm0, %v280_v9  ;;  %1196 = vmatmul.mubr.msk.bf16.vlgmr.msra.gmra.mrb[0].mxu0 %vm312_vm0, %v265_v10  ;;  %v266_v18 = vpack.c.bf16 %v205_v15, %v204_v13  ;;  %v207_v21 = vld [vmem:[%s1456_s9 + $0x38] sm:$0xff]  ;;  %v238_v22 = vld [vmem:[%s1456_s9 + $0x130] sm:$0xff] }
  0x1d   : > { %v282_v19 = vpack.c.bf16 %v237_v17, %v236_v16  ;;  %1228 = vmatmul.mubr.msk.bf16.vlgmr.msra.gmra.mrb[0].mxu1 %vm312_vm0, %v281_v14  ;;  %v239_v23 = vld [vmem:[%s1456_s9 + $0x138] sm:$0xff]  ;;  %v208_v24 = vld [vmem:[%s1456_s9 + $0x40] sm:$0xff]  ;;  %v209_v25 = vld [vmem:[%s1456_s9 + $0x48] sm:$0xff]  ;;  %v267_v28 = vpack.c.bf16 %v207_v21, %v206_v20  ;;  %p1315_p2 = por %p1314_p1, %p1313_p0 }
  0x1e   : > { %1199 = vmatprep.mubr.msk.bf16.mxu0 %vm312_vm0, %v266_v18  ;;  %v240_v26 = vld [vmem:[%s1456_s9 + $0x140] sm:$0xff]  ;;  %v241_v27 = vld [vmem:[%s1456_s9 + $0x148] sm:$0xff]  ;;  %v283_v29 = vpack.c.bf16 %v239_v23, %v238_v22  ;;  %v268_v30 = vpack.c.bf16 %v209_v25, %v208_v24  ;;  %v210_v32 = vld [vmem:[%s1456_s9 + $0x50] sm:$0xff] }
  0x1f   : > { %1231 = vmatprep.mubr.msk.bf16.mxu1 %vm312_vm0, %v282_v19  ;;  %v284_v31 = vpack.c.bf16 %v241_v27, %v240_v26  ;;  %v211_v33 = vld [vmem:[%s1456_s9 + $0x58] sm:$0xff]  ;;  %v242_v34 = vld [vmem:[%s1456_s9 + $0x150] sm:$0xff]  ;;  %v212_v36 = vld [vmem:[%s1456_s9 + $0x60] sm:$0xff]  ;;  %p1316_p3 = pnand %p1315_p2, %p1309_p13 }
  0x20   : > { %v243_v35 = vld [vmem:[%s1456_s9 + $0x158] sm:$0xff]  ;;  %v213_v37 = vld [vmem:[%s1456_s9 + $0x68] sm:$0xff]  ;;  %v244_v38 = vld [vmem:[%s1456_s9 + $0x160] sm:$0xff]  ;;  %v269_v40 = vpack.c.bf16 %v211_v33, %v210_v32 }
  0x21   : > { %v245_v39 = vld [vmem:[%s1456_s9 + $0x168] sm:$0xff]  ;;  %v285_v41 = vpack.c.bf16 %v243_v35, %v242_v34  ;;  %v270_v42 = vpack.c.bf16 %v213_v37, %v212_v36  ;;  %v214_v44 = vld [vmem:[%s1456_s9 + $0x70] sm:$0xff]  ;;  %v215_v45 = vld [vmem:[%s1456_s9 + $0x78] sm:$0xff] }
  0x22   : > { %v286_v43 = vpack.c.bf16 %v245_v39, %v244_v38  ;;  %v246_v46 = vld [vmem:[%s1456_s9 + $0x170] sm:$0xff]  ;;  %v247_v47 = vld [vmem:[%s1456_s9 + $0x178] sm:$0xff]  ;;  %v216_v48 = vld [vmem:[%s1456_s9 + $0x80] sm:$0xff]  ;;  %v271_v52 = vpack.c.bf16 %v215_v45, %v214_v44 }
  0x23   : > { %v217_v49 = vld [vmem:[%s1456_s9 + $0x88] sm:$0xff]  ;;  %v248_v50 = vld [vmem:[%s1456_s9 + $0x180] sm:$0xff]  ;;  %v287_v53 = vpack.c.bf16 %v247_v47, %v246_v46  ;;  %v218_v56 = vld [vmem:[%s1456_s9 + $0x90] sm:$0xff] }
  0x24   : > { %1200 = vmatmul.mubr.msk.bf16.gmra.mrb[4].mxu0 %vm312_vm0, %v267_v28  ;;  %v249_v51 = vld [vmem:[%s1456_s9 + $0x188] sm:$0xff]  ;;  %v272_v54 = vpack.c.bf16 %v217_v49, %v216_v48  ;;  %v219_v57 = vld [vmem:[%s1456_s9 + $0x98] sm:$0xff]  ;;  %v250_v58 = vld [vmem:[%s1456_s9 + $0x190] sm:$0xff] }
  0x25   : > { %1232 = vmatmul.mubr.msk.bf16.gmra.mrb[4].mxu1 %vm312_vm0, %v283_v29  ;;  %1203 = vmatprep.mubr.msk.bf16.mxu0 %vm312_vm0, %v268_v30  ;;  %v288_v55 = vpack.c.bf16 %v249_v51, %v248_v50  ;;  %v251_v59 = vld [vmem:[%s1456_s9 + $0x198] sm:$0xff]  ;;  %v220_v60 = vld [vmem:[%s1456_s9 + $0xa0] sm:$0xff]  ;;  %v221_v61 = vld [vmem:[%s1456_s9 + $0xa8] sm:$0xff]  ;;  %v273_v0 = vpack.c.bf16 %v219_v57, %v218_v56 }
  0x26   : > { %1235 = vmatprep.mubr.msk.bf16.mxu1 %vm312_vm0, %v284_v31  ;;  %v252_v62 = vld [vmem:[%s1456_s9 + $0x1a0] sm:$0xff]  ;;  %v253_v63 = vld [vmem:[%s1456_s9 + $0x1a8] sm:$0xff]  ;;  %v289_v1 = vpack.c.bf16 %v251_v59, %v250_v58  ;;  %v274_v2 = vpack.c.bf16 %v221_v61, %v220_v60  ;;  %v222_v4 = vld [vmem:[%s1456_s9 + $0xb0] sm:$0xff] }
  0x27   : > { %v290_v3 = vpack.c.bf16 %v253_v63, %v252_v62  ;;  %v223_v5 = vld [vmem:[%s1456_s9 + $0xb8] sm:$0xff]  ;;  %v254_v6 = vld [vmem:[%s1456_s9 + $0x1b0] sm:$0xff]  ;;  %v224_v8 = vld [vmem:[%s1456_s9 + $0xc0] sm:$0xff] }
  0x28   : > { %v255_v7 = vld [vmem:[%s1456_s9 + $0x1b8] sm:$0xff]  ;;  %v225_v9 = vld [vmem:[%s1456_s9 + $0xc8] sm:$0xff]  ;;  %v256_v10 = vld [vmem:[%s1456_s9 + $0x1c0] sm:$0xff]  ;;  %v275_v12 = vpack.c.bf16 %v223_v5, %v222_v4 }
  0x29   : > { %v257_v11 = vld [vmem:[%s1456_s9 + $0x1c8] sm:$0xff]  ;;  %v291_v13 = vpack.c.bf16 %v255_v7, %v254_v6  ;;  %v276_v14 = vpack.c.bf16 %v225_v9, %v224_v8  ;;  %v226_v16 = vld [vmem:[%s1456_s9 + $0xd0] sm:$0xff]  ;;  %v227_v17 = vld [vmem:[%s1456_s9 + $0xd8] sm:$0xff] }
  0x2a   : > { %v292_v15 = vpack.c.bf16 %v257_v11, %v256_v10  ;;  %v258_v18 = vld [vmem:[%s1456_s9 + $0x1d0] sm:$0xff]  ;;  %v259_v19 = vld [vmem:[%s1456_s9 + $0x1d8] sm:$0xff]  ;;  %v228_v20 = vld [vmem:[%s1456_s9 + $0xe0] sm:$0xff]  ;;  %v277_v24 = vpack.c.bf16 %v227_v17, %v226_v16 }
  0x2b   : > { %v229_v21 = vld [vmem:[%s1456_s9 + $0xe8] sm:$0xff]  ;;  %v260_v22 = vld [vmem:[%s1456_s9 + $0x1e0] sm:$0xff]  ;;  %v293_v25 = vpack.c.bf16 %v259_v19, %v258_v18  ;;  %v230_v28 = vld [vmem:[%s1456_s9 + $0xf0] sm:$0xff] }
  0x2c   : > { %1204 = vmatmul.mubr.msk.bf16.gmra.mrb[8].mxu0 %vm312_vm0, %v269_v40  ;;  %v261_v23 = vld [vmem:[%s1456_s9 + $0x1e8] sm:$0xff]  ;;  %v278_v26 = vpack.c.bf16 %v229_v21, %v228_v20  ;;  %v231_v29 = vld [vmem:[%s1456_s9 + $0xf8] sm:$0xff]  ;;  %v262_v30 = vld [vmem:[%s1456_s9 + $0x1f0] sm:$0xff] }
  0x2d   : > { %1236 = vmatmul.mubr.msk.bf16.gmra.mrb[8].mxu1 %vm312_vm0, %v285_v41  ;;  %1207 = vmatprep.mubr.msk.bf16.mxu0 %vm312_vm0, %v270_v42  ;;  %v294_v27 = vpack.c.bf16 %v261_v23, %v260_v22  ;;  %v263_v31 = vld [vmem:[%s1456_s9 + $0x1f8] sm:$0xff]  ;;  %v279_v32 = vpack.c.bf16 %v231_v29, %v230_v28  ;;  %v1557_v34 = vld [vmem:[%s1815_s2] ss:$0 sm:$0xff] }
  0x2e   : > { %1239 = vmatprep.mubr.msk.bf16.mxu1 %vm312_vm0, %v286_v43  ;;  %v295_v33 = vpack.c.bf16 %v263_v31, %v262_v30  ;;  %v1563_v36 = vld [vmem:[%s1816_s3] ss:$0 sm:$0xff] }
  0x34   : > { %1208 = vmatmul.mubr.msk.bf16.gmra.mrb[12].mxu0 %vm312_vm0, %v271_v52 }
  0x35   : > { %1240 = vmatmul.mubr.msk.bf16.gmra.mrb[12].mxu1 %vm312_vm0, %v287_v53  ;;  %1211 = vmatprep.mubr.msk.bf16.mxu0 %vm312_vm0, %v272_v54 }
  0x36   : > { %1243 = vmatprep.mubr.msk.bf16.mxu1 %vm312_vm0, %v288_v55 }
  0x3c   : > { %1212 = vmatmul.mubr.msk.bf16.gmra.mrb[16].mxu0 %vm312_vm0, %v273_v0 }
  0x3d   : > { %1244 = vmatmul.mubr.msk.bf16.gmra.mrb[16].mxu1 %vm312_vm0, %v289_v1  ;;  %1215 = vmatprep.mubr.msk.bf16.mxu0 %vm312_vm0, %v274_v2 }
  0x3e   : > { %1247 = vmatprep.mubr.msk.bf16.mxu1 %vm312_vm0, %v290_v3 }
  0x44   : > { %1216 = vmatmul.mubr.msk.bf16.gmra.mrb[20].mxu0 %vm312_vm0, %v275_v12 }
  0x45   : > { %1248 = vmatmul.mubr.msk.bf16.gmra.mrb[20].mxu1 %vm312_vm0, %v291_v13  ;;  %1219 = vmatprep.mubr.msk.bf16.mxu0 %vm312_vm0, %v276_v14 }
  0x46   : > { %1251 = vmatprep.mubr.msk.bf16.mxu1 %vm312_vm0, %v292_v15 }
  0x4c   : > { %1220 = vmatmul.mubr.msk.bf16.gmra.mrb[24].mxu0 %vm312_vm0, %v277_v24 }
  0x4d   : > { %1252 = vmatmul.mubr.msk.bf16.gmra.mrb[24].mxu1 %vm312_vm0, %v293_v25  ;;  %1223 = vmatprep.mubr.msk.bf16.mxu0 %vm312_vm0, %v278_v26 }
  0x4e   : > { %1255 = vmatprep.mubr.msk.bf16.mxu1 %vm312_vm0, %v294_v27 }
  0x54   : > { %1224 = vmatmul.mubr.msk.bf16.gmra.mrb[28].mxu0 %vm312_vm0, %v279_v32 }
  0x55   : > { %1256 = vmatmul.mubr.msk.bf16.gmra.mrb[28].mxu1 %vm312_vm0, %v295_v33 }
  0xef   : > { %v1197_v35 = vpop.f32.mrb[0].mxu0 }
  0xf0   : > { %v707_v37 = vmul.f32 %v1197_v35, %v1557_v34  ;;  %v1229_v38 = vpop.f32.mrb[0].mxu1  ;;  %v443_v39 = vpop.f32.mrb[1].mxu0 }
  0xf1   : > { %v739_v40 = vmul.f32 %v1229_v38, %v1557_v34  ;;  %v705_v41 = vmul.f32 %v1557_v34, %v443_v39  ;;  %v571_v42 = vpop.f32.mrb[1].mxu1  ;;  %v1198_v43 = vpop.f32.mrb[2].mxu0 }
  0xf2   : > { %v778_v44 = vadd.f32 %v1563_v36, %v707_v37  ;;  %v737_v45 = vmul.f32 %v1557_v34, %v571_v42  ;;  %v708_v46 = vmul.f32 %v1198_v43, %v1557_v34  ;;  %v1230_v47 = vpop.f32.mrb[2].mxu1  ;;  %v446_v48 = vpop.f32.mrb[3].mxu0 }
  0xf3   : > { %v810_v49 = vadd.f32 %v1563_v36, %v739_v40  ;;  %v776_v50 = vadd.f32 %v1563_v36, %v705_v41  ;;  %v740_v51 = vmul.f32 %v1230_v47, %v1557_v34  ;;  %v706_v52 = vmul.f32 %v1557_v34, %v446_v48  ;;  %v574_v53 = vpop.f32.mrb[3].mxu1 }
  0xf4   : > { %v842_v54 = vmax.f32 %v778_v44, 0.0  ;;  %v808_v55 = vadd.f32 %v1563_v36, %v737_v45  ;;  %v779_v56 = vadd.f32 %v1563_v36, %v708_v46  ;;  %v738_v57 = vmul.f32 %v1557_v34, %v574_v53 }
  0xf5   : > { %v874_v58 = vmax.f32 %v810_v49, 0.0  ;;  %v840_v59 = vmax.f32 %v776_v50, 0.0  ;;  %v811_v60 = vadd.f32 %v1563_v36, %v740_v51  ;;  %v777_v61 = vadd.f32 %v1563_v36, %v706_v52 }
  0xf6   : > { %v906_v62 = vmin.f32 %v842_v54, 6.0  ;;  %v872_v63 = vmax.f32 %v808_v55, 0.0  ;;  %v843_v0 = vmax.f32 %v779_v56, 0.0  ;;  %v809_v1 = vadd.f32 %v1563_v36, %v738_v57 }
  0xf7   : > { %v938_v2 = vmin.f32 %v874_v58, 6.0  ;;  %v904_v3 = vmin.f32 %v840_v59, 6.0  ;;  %v875_v4 = vmax.f32 %v811_v60, 0.0  ;;  %v841_v5 = vmax.f32 %v777_v61, 0.0  ;;  %v1201_v6 = vpop.f32.mrb[4].mxu0 }
  0xf8   : > { %970 = vst [vmem:[%s1583_s22 + $0x10] sm:$0xff] %v906_v62  ;;  %v936_v7 = vmin.f32 %v872_v63, 6.0  ;;  %v907_v8 = vmin.f32 %v843_v0, 6.0  ;;  %v873_v9 = vmax.f32 %v809_v1, 0.0  ;;  %v711_v10 = vmul.f32 %v1201_v6, %v1557_v34  ;;  %v1233_v11 = vpop.f32.mrb[4].mxu1  ;;  %v459_v12 = vpop.f32.mrb[5].mxu0 }
  0xf9   : > { %1002 = vst [vmem:[%s1583_s22 + $0x110] sm:$0xff] %v938_v2  ;;  %968 = vst [vmem:[%s1583_s22] sm:$0xff] %v904_v3  ;;  %v939_v13 = vmin.f32 %v875_v4, 6.0  ;;  %v905_v14 = vmin.f32 %v841_v5, 6.0  ;;  %v743_v15 = vmul.f32 %v1233_v11, %v1557_v34  ;;  %v709_v16 = vmul.f32 %v1557_v34, %v459_v12  ;;  %v587_v17 = vpop.f32.mrb[5].mxu1  ;;  %v1202_v18 = vpop.f32.mrb[6].mxu0 }
  0xfa   : > { %1000 = vst [vmem:[%s1583_s22 + $0x100] sm:$0xff] %v936_v7  ;;  %971 = vst [vmem:[%s1583_s22 + $0x18] sm:$0xff] %v907_v8  ;;  %v937_v19 = vmin.f32 %v873_v9, 6.0  ;;  %v782_v20 = vadd.f32 %v1563_v36, %v711_v10  ;;  %v741_v21 = vmul.f32 %v1557_v34, %v587_v17  ;;  %v712_v22 = vmul.f32 %v1202_v18, %v1557_v34  ;;  %v1234_v23 = vpop.f32.mrb[6].mxu1  ;;  %v462_v24 = vpop.f32.mrb[7].mxu0 }
  0xfb   : > { %1003 = vst [vmem:[%s1583_s22 + $0x118] sm:$0xff] %v939_v13  ;;  %969 = vst [vmem:[%s1583_s22 + $0x8] sm:$0xff] %v905_v14  ;;  %v814_v25 = vadd.f32 %v1563_v36, %v743_v15  ;;  %v780_v26 = vadd.f32 %v1563_v36, %v709_v16  ;;  %v744_v27 = vmul.f32 %v1234_v23, %v1557_v34  ;;  %v590_v29 = vpop.f32.mrb[7].mxu1 }
  0xfc   : > { %v710_v28 = vmul.f32 %v1557_v34, %v462_v24  ;;  %1001 = vst [vmem:[%s1583_s22 + $0x108] sm:$0xff] %v937_v19  ;;  %v846_v30 = vmax.f32 %v782_v20, 0.0  ;;  %v812_v31 = vadd.f32 %v1563_v36, %v741_v21  ;;  %v783_v32 = vadd.f32 %v1563_v36, %v712_v22 }
  0xfd   : > { %v742_v33 = vmul.f32 %v1557_v34, %v590_v29  ;;  %v878_v35 = vmax.f32 %v814_v25, 0.0  ;;  %v844_v37 = vmax.f32 %v780_v26, 0.0  ;;  %v815_v38 = vadd.f32 %v1563_v36, %v744_v27 }
  0xfe   : > { %v781_v39 = vadd.f32 %v1563_v36, %v710_v28  ;;  %v910_v40 = vmin.f32 %v846_v30, 6.0  ;;  %v876_v41 = vmax.f32 %v812_v31, 0.0  ;;  %v847_v42 = vmax.f32 %v783_v32, 0.0 }
  0xff   : > { %v813_v43 = vadd.f32 %v1563_v36, %v742_v33  ;;  %v942_v44 = vmin.f32 %v878_v35, 6.0  ;;  %v908_v45 = vmin.f32 %v844_v37, 6.0  ;;  %v879_v46 = vmax.f32 %v815_v38, 0.0  ;;  %v1205_v48 = vpop.f32.mrb[8].mxu0 }
 0x100   : > { %v845_v47 = vmax.f32 %v781_v39, 0.0  ;;  %974 = vst [vmem:[%s1583_s22 + $0x30] sm:$0xff] %v910_v40  ;;  %v940_v49 = vmin.f32 %v876_v41, 6.0  ;;  %v911_v50 = vmin.f32 %v847_v42, 6.0  ;;  %v715_v52 = vmul.f32 %v1205_v48, %v1557_v34  ;;  %v1237_v53 = vpop.f32.mrb[8].mxu1  ;;  %v475_v54 = vpop.f32.mrb[9].mxu0 }
 0x101   : > { %v877_v51 = vmax.f32 %v813_v43, 0.0  ;;  %1006 = vst [vmem:[%s1583_s22 + $0x130] sm:$0xff] %v942_v44  ;;  %972 = vst [vmem:[%s1583_s22 + $0x20] sm:$0xff] %v908_v45  ;;  %v943_v55 = vmin.f32 %v879_v46, 6.0  ;;  %v747_v57 = vmul.f32 %v1237_v53, %v1557_v34  ;;  %v713_v58 = vmul.f32 %v1557_v34, %v475_v54  ;;  %v603_v59 = vpop.f32.mrb[9].mxu1  ;;  %v1206_v60 = vpop.f32.mrb[10].mxu0 }
 0x102   : > { %v909_v56 = vmin.f32 %v845_v47, 6.0  ;;  %1004 = vst [vmem:[%s1583_s22 + $0x120] sm:$0xff] %v940_v49  ;;  %975 = vst [vmem:[%s1583_s22 + $0x38] sm:$0xff] %v911_v50  ;;  %v786_v62 = vadd.f32 %v1563_v36, %v715_v52  ;;  %v745_v63 = vmul.f32 %v1557_v34, %v603_v59  ;;  %v716_v0 = vmul.f32 %v1206_v60, %v1557_v34  ;;  %v1238_v1 = vpop.f32.mrb[10].mxu1  ;;  %v478_v2 = vpop.f32.mrb[11].mxu0 }
 0x103   : > { %v941_v61 = vmin.f32 %v877_v51, 6.0  ;;  %1007 = vst [vmem:[%s1583_s22 + $0x138] sm:$0xff] %v943_v55  ;;  %v818_v3 = vadd.f32 %v1563_v36, %v747_v57  ;;  %v784_v4 = vadd.f32 %v1563_v36, %v713_v58  ;;  %v748_v5 = vmul.f32 %v1238_v1, %v1557_v34  ;;  %v606_v7 = vpop.f32.mrb[11].mxu1 }
 0x104   : > { %973 = vst [vmem:[%s1583_s22 + $0x28] sm:$0xff] %v909_v56  ;;  %v714_v6 = vmul.f32 %v1557_v34, %v478_v2  ;;  %v850_v8 = vmax.f32 %v786_v62, 0.0  ;;  %v816_v9 = vadd.f32 %v1563_v36, %v745_v63  ;;  %v787_v10 = vadd.f32 %v1563_v36, %v716_v0 }
 0x105   : > { %1005 = vst [vmem:[%s1583_s22 + $0x128] sm:$0xff] %v941_v61  ;;  %v746_v11 = vmul.f32 %v1557_v34, %v606_v7  ;;  %v882_v12 = vmax.f32 %v818_v3, 0.0  ;;  %v848_v13 = vmax.f32 %v784_v4, 0.0  ;;  %v819_v14 = vadd.f32 %v1563_v36, %v748_v5 }
 0x106   : > { %v785_v15 = vadd.f32 %v1563_v36, %v714_v6  ;;  %v914_v16 = vmin.f32 %v850_v8, 6.0  ;;  %v880_v17 = vmax.f32 %v816_v9, 0.0  ;;  %v851_v18 = vmax.f32 %v787_v10, 0.0 }
 0x107   : > { %v817_v19 = vadd.f32 %v1563_v36, %v746_v11  ;;  %v946_v20 = vmin.f32 %v882_v12, 6.0  ;;  %v912_v21 = vmin.f32 %v848_v13, 6.0  ;;  %v883_v22 = vmax.f32 %v819_v14, 0.0  ;;  %v1209_v24 = vpop.f32.mrb[12].mxu0 }
 0x108   : > { %v849_v23 = vmax.f32 %v785_v15, 0.0  ;;  %978 = vst [vmem:[%s1583_s22 + $0x50] sm:$0xff] %v914_v16  ;;  %v944_v25 = vmin.f32 %v880_v17, 6.0  ;;  %v915_v26 = vmin.f32 %v851_v18, 6.0  ;;  %v719_v28 = vmul.f32 %v1209_v24, %v1557_v34  ;;  %v1241_v29 = vpop.f32.mrb[12].mxu1  ;;  %v491_v30 = vpop.f32.mrb[13].mxu0 }
 0x109   : > { %v881_v27 = vmax.f32 %v817_v19, 0.0  ;;  %1010 = vst [vmem:[%s1583_s22 + $0x150] sm:$0xff] %v946_v20  ;;  %976 = vst [vmem:[%s1583_s22 + $0x40] sm:$0xff] %v912_v21  ;;  %v947_v31 = vmin.f32 %v883_v22, 6.0  ;;  %v751_v33 = vmul.f32 %v1241_v29, %v1557_v34  ;;  %v717_v35 = vmul.f32 %v1557_v34, %v491_v30  ;;  %v619_v37 = vpop.f32.mrb[13].mxu1  ;;  %v1210_v38 = vpop.f32.mrb[14].mxu0 }
 0x10a   : > { %v913_v32 = vmin.f32 %v849_v23, 6.0  ;;  %1008 = vst [vmem:[%s1583_s22 + $0x140] sm:$0xff] %v944_v25  ;;  %979 = vst [vmem:[%s1583_s22 + $0x58] sm:$0xff] %v915_v26  ;;  %v790_v40 = vadd.f32 %v1563_v36, %v719_v28  ;;  %v749_v41 = vmul.f32 %v1557_v34, %v619_v37  ;;  %v720_v42 = vmul.f32 %v1210_v38, %v1557_v34  ;;  %v1242_v43 = vpop.f32.mrb[14].mxu1  ;;  %v494_v44 = vpop.f32.mrb[15].mxu0 }
 0x10b   : > { %v945_v39 = vmin.f32 %v881_v27, 6.0  ;;  %1011 = vst [vmem:[%s1583_s22 + $0x158] sm:$0xff] %v947_v31  ;;  %v822_v45 = vadd.f32 %v1563_v36, %v751_v33  ;;  %v788_v46 = vadd.f32 %v1563_v36, %v717_v35  ;;  %v752_v47 = vmul.f32 %v1242_v43, %v1557_v34  ;;  %v622_v49 = vpop.f32.mrb[15].mxu1 }
 0x10c   : > { %977 = vst [vmem:[%s1583_s22 + $0x48] sm:$0xff] %v913_v32  ;;  %v718_v48 = vmul.f32 %v1557_v34, %v494_v44  ;;  %v854_v50 = vmax.f32 %v790_v40, 0.0  ;;  %v820_v51 = vadd.f32 %v1563_v36, %v749_v41  ;;  %v791_v52 = vadd.f32 %v1563_v36, %v720_v42 }
 0x10d   : > { %1009 = vst [vmem:[%s1583_s22 + $0x148] sm:$0xff] %v945_v39  ;;  %v750_v53 = vmul.f32 %v1557_v34, %v622_v49  ;;  %v886_v54 = vmax.f32 %v822_v45, 0.0  ;;  %v852_v55 = vmax.f32 %v788_v46, 0.0  ;;  %v823_v56 = vadd.f32 %v1563_v36, %v752_v47 }
 0x10e   : > { %v789_v57 = vadd.f32 %v1563_v36, %v718_v48  ;;  %v918_v58 = vmin.f32 %v854_v50, 6.0  ;;  %v884_v59 = vmax.f32 %v820_v51, 0.0  ;;  %v855_v60 = vmax.f32 %v791_v52, 0.0 }
 0x10f   : > { %v821_v61 = vadd.f32 %v1563_v36, %v750_v53  ;;  %v950_v62 = vmin.f32 %v886_v54, 6.0  ;;  %v916_v63 = vmin.f32 %v852_v55, 6.0  ;;  %v887_v0 = vmax.f32 %v823_v56, 0.0  ;;  %v1213_v2 = vpop.f32.mrb[16].mxu0 }
 0x110   : > { %v853_v1 = vmax.f32 %v789_v57, 0.0  ;;  %982 = vst [vmem:[%s1583_s22 + $0x70] sm:$0xff] %v918_v58  ;;  %v948_v3 = vmin.f32 %v884_v59, 6.0  ;;  %v919_v4 = vmin.f32 %v855_v60, 6.0  ;;  %v723_v6 = vmul.f32 %v1213_v2, %v1557_v34  ;;  %v1245_v7 = vpop.f32.mrb[16].mxu1  ;;  %v507_v8 = vpop.f32.mrb[17].mxu0 }
 0x111   : > { %v885_v5 = vmax.f32 %v821_v61, 0.0  ;;  %1014 = vst [vmem:[%s1583_s22 + $0x170] sm:$0xff] %v950_v62  ;;  %980 = vst [vmem:[%s1583_s22 + $0x60] sm:$0xff] %v916_v63  ;;  %v951_v9 = vmin.f32 %v887_v0, 6.0  ;;  %v755_v11 = vmul.f32 %v1245_v7, %v1557_v34  ;;  %v721_v12 = vmul.f32 %v1557_v34, %v507_v8  ;;  %v635_v13 = vpop.f32.mrb[17].mxu1  ;;  %v1214_v14 = vpop.f32.mrb[18].mxu0 }
 0x112   : > { %v917_v10 = vmin.f32 %v853_v1, 6.0  ;;  %1012 = vst [vmem:[%s1583_s22 + $0x160] sm:$0xff] %v948_v3  ;;  %983 = vst [vmem:[%s1583_s22 + $0x78] sm:$0xff] %v919_v4  ;;  %v794_v16 = vadd.f32 %v1563_v36, %v723_v6  ;;  %v753_v17 = vmul.f32 %v1557_v34, %v635_v13  ;;  %v724_v18 = vmul.f32 %v1214_v14, %v1557_v34  ;;  %v1246_v19 = vpop.f32.mrb[18].mxu1  ;;  %v510_v20 = vpop.f32.mrb[19].mxu0 }
 0x113   : > { %v949_v15 = vmin.f32 %v885_v5, 6.0  ;;  %1015 = vst [vmem:[%s1583_s22 + $0x178] sm:$0xff] %v951_v9  ;;  %v826_v21 = vadd.f32 %v1563_v36, %v755_v11  ;;  %v792_v22 = vadd.f32 %v1563_v36, %v721_v12  ;;  %v756_v23 = vmul.f32 %v1246_v19, %v1557_v34  ;;  %v638_v25 = vpop.f32.mrb[19].mxu1 }
 0x114   : > { %981 = vst [vmem:[%s1583_s22 + $0x68] sm:$0xff] %v917_v10  ;;  %v722_v24 = vmul.f32 %v1557_v34, %v510_v20  ;;  %v858_v26 = vmax.f32 %v794_v16, 0.0  ;;  %v824_v27 = vadd.f32 %v1563_v36, %v753_v17  ;;  %v795_v28 = vadd.f32 %v1563_v36, %v724_v18 }
 0x115   : > { %1013 = vst [vmem:[%s1583_s22 + $0x168] sm:$0xff] %v949_v15  ;;  %v754_v29 = vmul.f32 %v1557_v34, %v638_v25  ;;  %v890_v30 = vmax.f32 %v826_v21, 0.0  ;;  %v856_v31 = vmax.f32 %v792_v22, 0.0  ;;  %v827_v32 = vadd.f32 %v1563_v36, %v756_v23 }
 0x116   : > { %v793_v33 = vadd.f32 %v1563_v36, %v722_v24  ;;  %v922_v35 = vmin.f32 %v858_v26, 6.0  ;;  %v888_v37 = vmax.f32 %v824_v27, 0.0  ;;  %v859_v38 = vmax.f32 %v795_v28, 0.0 }
 0x117   : > { %v825_v39 = vadd.f32 %v1563_v36, %v754_v29  ;;  %v954_v40 = vmin.f32 %v890_v30, 6.0  ;;  %v920_v41 = vmin.f32 %v856_v31, 6.0  ;;  %v891_v42 = vmax.f32 %v827_v32, 0.0  ;;  %v1217_v44 = vpop.f32.mrb[20].mxu0 }
 0x118   : > { %v857_v43 = vmax.f32 %v793_v33, 0.0  ;;  %986 = vst [vmem:[%s1583_s22 + $0x90] sm:$0xff] %v922_v35  ;;  %v952_v45 = vmin.f32 %v888_v37, 6.0  ;;  %v923_v46 = vmin.f32 %v859_v38, 6.0  ;;  %v727_v48 = vmul.f32 %v1217_v44, %v1557_v34  ;;  %v1249_v49 = vpop.f32.mrb[20].mxu1  ;;  %v523_v50 = vpop.f32.mrb[21].mxu0 }
 0x119   : > { %v889_v47 = vmax.f32 %v825_v39, 0.0  ;;  %1018 = vst [vmem:[%s1583_s22 + $0x190] sm:$0xff] %v954_v40  ;;  %984 = vst [vmem:[%s1583_s22 + $0x80] sm:$0xff] %v920_v41  ;;  %v955_v51 = vmin.f32 %v891_v42, 6.0  ;;  %v759_v53 = vmul.f32 %v1249_v49, %v1557_v34  ;;  %v725_v54 = vmul.f32 %v1557_v34, %v523_v50  ;;  %v651_v55 = vpop.f32.mrb[21].mxu1  ;;  %v1218_v56 = vpop.f32.mrb[22].mxu0 }
 0x11a   : > { %v921_v52 = vmin.f32 %v857_v43, 6.0  ;;  %1016 = vst [vmem:[%s1583_s22 + $0x180] sm:$0xff] %v952_v45  ;;  %987 = vst [vmem:[%s1583_s22 + $0x98] sm:$0xff] %v923_v46  ;;  %v798_v58 = vadd.f32 %v1563_v36, %v727_v48  ;;  %v757_v59 = vmul.f32 %v1557_v34, %v651_v55  ;;  %v728_v60 = vmul.f32 %v1218_v56, %v1557_v34  ;;  %v1250_v61 = vpop.f32.mrb[22].mxu1  ;;  %v526_v62 = vpop.f32.mrb[23].mxu0 }
 0x11b   : > { %v953_v57 = vmin.f32 %v889_v47, 6.0  ;;  %1019 = vst [vmem:[%s1583_s22 + $0x198] sm:$0xff] %v955_v51  ;;  %v830_v63 = vadd.f32 %v1563_v36, %v759_v53  ;;  %v796_v0 = vadd.f32 %v1563_v36, %v725_v54  ;;  %v760_v1 = vmul.f32 %v1250_v61, %v1557_v34  ;;  %v654_v3 = vpop.f32.mrb[23].mxu1 }
 0x11c   : > { %985 = vst [vmem:[%s1583_s22 + $0x88] sm:$0xff] %v921_v52  ;;  %v726_v2 = vmul.f32 %v1557_v34, %v526_v62  ;;  %v862_v4 = vmax.f32 %v798_v58, 0.0  ;;  %v828_v5 = vadd.f32 %v1563_v36, %v757_v59  ;;  %v799_v6 = vadd.f32 %v1563_v36, %v728_v60 }
 0x11d   : > { %1017 = vst [vmem:[%s1583_s22 + $0x188] sm:$0xff] %v953_v57  ;;  %v758_v7 = vmul.f32 %v1557_v34, %v654_v3  ;;  %v894_v8 = vmax.f32 %v830_v63, 0.0  ;;  %v860_v9 = vmax.f32 %v796_v0, 0.0  ;;  %v831_v10 = vadd.f32 %v1563_v36, %v760_v1 }
 0x11e   : > { %v797_v11 = vadd.f32 %v1563_v36, %v726_v2  ;;  %v926_v12 = vmin.f32 %v862_v4, 6.0  ;;  %v892_v13 = vmax.f32 %v828_v5, 0.0  ;;  %v863_v14 = vmax.f32 %v799_v6, 0.0 }
 0x11f   : > { %v829_v15 = vadd.f32 %v1563_v36, %v758_v7  ;;  %v958_v16 = vmin.f32 %v894_v8, 6.0  ;;  %v924_v17 = vmin.f32 %v860_v9, 6.0  ;;  %v895_v18 = vmax.f32 %v831_v10, 0.0  ;;  %v1221_v20 = vpop.f32.mrb[24].mxu0 }
 0x120   : > { %v861_v19 = vmax.f32 %v797_v11, 0.0  ;;  %990 = vst [vmem:[%s1583_s22 + $0xb0] sm:$0xff] %v926_v12  ;;  %v956_v21 = vmin.f32 %v892_v13, 6.0  ;;  %v927_v22 = vmin.f32 %v863_v14, 6.0  ;;  %v731_v24 = vmul.f32 %v1221_v20, %v1557_v34  ;;  %v1253_v25 = vpop.f32.mrb[24].mxu1  ;;  %v539_v26 = vpop.f32.mrb[25].mxu0 }
 0x121   : > { %v893_v23 = vmax.f32 %v829_v15, 0.0  ;;  %1022 = vst [vmem:[%s1583_s22 + $0x1b0] sm:$0xff] %v958_v16  ;;  %988 = vst [vmem:[%s1583_s22 + $0xa0] sm:$0xff] %v924_v17  ;;  %v959_v27 = vmin.f32 %v895_v18, 6.0  ;;  %v763_v29 = vmul.f32 %v1253_v25, %v1557_v34  ;;  %v729_v30 = vmul.f32 %v1557_v34, %v539_v26  ;;  %v667_v31 = vpop.f32.mrb[25].mxu1  ;;  %v1222_v32 = vpop.f32.mrb[26].mxu0 }
 0x122   : > { %v925_v28 = vmin.f32 %v861_v19, 6.0  ;;  %1020 = vst [vmem:[%s1583_s22 + $0x1a0] sm:$0xff] %v956_v21  ;;  %991 = vst [vmem:[%s1583_s22 + $0xb8] sm:$0xff] %v927_v22  ;;  %v802_v35 = vadd.f32 %v1563_v36, %v731_v24  ;;  %v761_v37 = vmul.f32 %v1557_v34, %v667_v31  ;;  %v732_v38 = vmul.f32 %v1222_v32, %v1557_v34  ;;  %v1254_v39 = vpop.f32.mrb[26].mxu1  ;;  %v542_v40 = vpop.f32.mrb[27].mxu0 }
 0x123   : > { %v957_v33 = vmin.f32 %v893_v23, 6.0  ;;  %1023 = vst [vmem:[%s1583_s22 + $0x1b8] sm:$0xff] %v959_v27  ;;  %v834_v41 = vadd.f32 %v1563_v36, %v763_v29  ;;  %v800_v42 = vadd.f32 %v1563_v36, %v729_v30  ;;  %v764_v43 = vmul.f32 %v1254_v39, %v1557_v34  ;;  %v670_v45 = vpop.f32.mrb[27].mxu1 }
 0x124   : > { %989 = vst [vmem:[%s1583_s22 + $0xa8] sm:$0xff] %v925_v28  ;;  %v730_v44 = vmul.f32 %v1557_v34, %v542_v40  ;;  %v866_v46 = vmax.f32 %v802_v35, 0.0  ;;  %v832_v47 = vadd.f32 %v1563_v36, %v761_v37  ;;  %v803_v48 = vadd.f32 %v1563_v36, %v732_v38 }
 0x125   : > { %1021 = vst [vmem:[%s1583_s22 + $0x1a8] sm:$0xff] %v957_v33  ;;  %v762_v49 = vmul.f32 %v1557_v34, %v670_v45  ;;  %v898_v50 = vmax.f32 %v834_v41, 0.0  ;;  %v864_v51 = vmax.f32 %v800_v42, 0.0  ;;  %v835_v52 = vadd.f32 %v1563_v36, %v764_v43 }
 0x126   : > { %v801_v53 = vadd.f32 %v1563_v36, %v730_v44  ;;  %v930_v54 = vmin.f32 %v866_v46, 6.0  ;;  %v896_v55 = vmax.f32 %v832_v47, 0.0  ;;  %v867_v56 = vmax.f32 %v803_v48, 0.0 }
 0x127   : > { %v833_v57 = vadd.f32 %v1563_v36, %v762_v49  ;;  %v962_v58 = vmin.f32 %v898_v50, 6.0  ;;  %v928_v59 = vmin.f32 %v864_v51, 6.0  ;;  %v899_v60 = vmax.f32 %v835_v52, 0.0  ;;  %v1225_v62 = vpop.f32.mrb[28].mxu0 }
 0x128   : > { %v865_v61 = vmax.f32 %v801_v53, 0.0  ;;  %994 = vst [vmem:[%s1583_s22 + $0xd0] sm:$0xff] %v930_v54  ;;  %v960_v63 = vmin.f32 %v896_v55, 6.0  ;;  %v931_v0 = vmin.f32 %v867_v56, 6.0  ;;  %v735_v2 = vmul.f32 %v1225_v62, %v1557_v34  ;;  %v1257_v3 = vpop.f32.mrb[28].mxu1  ;;  %v555_v4 = vpop.f32.mrb[29].mxu0 }
 0x129   : > { %v897_v1 = vmax.f32 %v833_v57, 0.0  ;;  %1026 = vst [vmem:[%s1583_s22 + $0x1d0] sm:$0xff] %v962_v58  ;;  %992 = vst [vmem:[%s1583_s22 + $0xc0] sm:$0xff] %v928_v59  ;;  %v963_v5 = vmin.f32 %v899_v60, 6.0  ;;  %v767_v7 = vmul.f32 %v1257_v3, %v1557_v34  ;;  %v733_v8 = vmul.f32 %v1557_v34, %v555_v4  ;;  %v683_v9 = vpop.f32.mrb[29].mxu1  ;;  %v1226_v10 = vpop.f32.mrb[30].mxu0 }
 0x12a   : > { %v929_v6 = vmin.f32 %v865_v61, 6.0  ;;  %1024 = vst [vmem:[%s1583_s22 + $0x1c0] sm:$0xff] %v960_v63  ;;  %995 = vst [vmem:[%s1583_s22 + $0xd8] sm:$0xff] %v931_v0  ;;  %v806_v12 = vadd.f32 %v1563_v36, %v735_v2  ;;  %v765_v13 = vmul.f32 %v1557_v34, %v683_v9  ;;  %v736_v14 = vmul.f32 %v1226_v10, %v1557_v34  ;;  %v1258_v15 = vpop.f32.mrb[30].mxu1  ;;  %v558_v16 = vpop.f32.mrb[31].mxu0 }
 0x12b   : > { %v961_v11 = vmin.f32 %v897_v1, 6.0  ;;  %1027 = vst [vmem:[%s1583_s22 + $0x1d8] sm:$0xff] %v963_v5  ;;  %v838_v17 = vadd.f32 %v1563_v36, %v767_v7  ;;  %v804_v18 = vadd.f32 %v1563_v36, %v733_v8  ;;  %v768_v19 = vmul.f32 %v1258_v15, %v1557_v34  ;;  %v686_v21 = vpop.f32.mrb[31].mxu1 }
 0x12c   : > { %993 = vst [vmem:[%s1583_s22 + $0xc8] sm:$0xff] %v929_v6  ;;  %v734_v20 = vmul.f32 %v1557_v34, %v558_v16  ;;  %v870_v22 = vmax.f32 %v806_v12, 0.0  ;;  %v836_v23 = vadd.f32 %v1563_v36, %v765_v13  ;;  %v807_v24 = vadd.f32 %v1563_v36, %v736_v14 }
 0x12d   : > { %1025 = vst [vmem:[%s1583_s22 + $0x1c8] sm:$0xff] %v961_v11  ;;  %v766_v25 = vmul.f32 %v1557_v34, %v686_v21  ;;  %v902_v26 = vmax.f32 %v838_v17, 0.0  ;;  %v868_v27 = vmax.f32 %v804_v18, 0.0  ;;  %v839_v28 = vadd.f32 %v1563_v36, %v768_v19 }
 0x12e   : > { %v805_v29 = vadd.f32 %v1563_v36, %v734_v20  ;;  %v934_v30 = vmin.f32 %v870_v22, 6.0  ;;  %v900_v31 = vmax.f32 %v836_v23, 0.0  ;;  %v871_v32 = vmax.f32 %v807_v24, 0.0 }
 0x12f   : > { %v837_v33 = vadd.f32 %v1563_v36, %v766_v25  ;;  %v966_v35 = vmin.f32 %v902_v26, 6.0  ;;  %v932_v37 = vmin.f32 %v868_v27, 6.0  ;;  %v903_v34 = vmax.f32 %v839_v28, 0.0 }
 0x130   : > { %v869_v38 = vmax.f32 %v805_v29, 0.0  ;;  %998 = vst [vmem:[%s1583_s22 + $0xf0] sm:$0xff] %v934_v30  ;;  %v964_v39 = vmin.f32 %v900_v31, 6.0  ;;  %v935_v40 = vmin.f32 %v871_v32, 6.0 }
 0x131   : > { %v901_v41 = vmax.f32 %v837_v33, 0.0  ;;  %1030 = vst [vmem:[%s1583_s22 + $0x1f0] sm:$0xff] %v966_v35  ;;  %996 = vst [vmem:[%s1583_s22 + $0xe0] sm:$0xff] %v932_v37  ;;  %v967_v36 = vmin.f32 %v903_v34, 6.0 }
 0x132   : > { %v933_v42 = vmin.f32 %v869_v38, 6.0  ;;  %1028 = vst [vmem:[%s1583_s22 + $0x1e0] sm:$0xff] %v964_v39  ;;  %999 = vst [vmem:[%s1583_s22 + $0xf8] sm:$0xff] %v935_v40 }
 0x133   : > { %v965_v43 = vmin.f32 %v901_v41, 6.0  ;;  %1031 = vst [vmem:[%s1583_s22 + $0x1f8] sm:$0xff] %v967_v36 }
 0x134   : > { %997 = vst [vmem:[%s1583_s22 + $0xe8] sm:$0xff] %v933_v42 }
 0x135   : > { %1029 = vst [vmem:[%s1583_s22 + $0x1e8] sm:$0xff] %v965_v43 }
 0x136   : > { %1319 = shalt.err (!%p1316_p3)
}
 0x137   : > { %s1320_s9 = scalar_lea.hbm %s1761_s29, 8192  ;;  %s1324_s12 = scalar_lea.hbm %s1817_s4, 32768 }
 0x138   : > { %p1321_p4 = scmp.ne.s32.totalorder %s1761_s29, %s1320_s9  ;;  %p1325_p9 = scmp.lt.u32.totalorder %s1761_s29, %s1817_s4 }
 0x139   : > { %p1326_p10 = scmp.lt.u32.totalorder %s1324_s12, %s1320_s9  ;;  %p1328_p12 = scmp.lt.u32.totalorder %s1320_s9, %s1761_s29 }
 0x13a   : > { %p1322_p7 = pnand %p1321_p4, %p1436_p5 }
 0x13b   : > { %p1327_p11 = por %p1326_p10, %p1325_p9 }
 0x13c   : > { %p1323_p8 = pneg %p1322_p7 }
 0x13d   : > { %p1329_p13 = por %p1328_p12, %p1327_p11 }
 0x13f   : > { %p1330_p0 = pnand %p1329_p13, %p1323_p8 }
 0x141   : > { %1333 = shalt.err (!%p1330_p0)
}
 0x142   : > { %s1371_s20 = smov 128   ;;  %s1372_s22 = smov 8  }
 0x143   : > { %1263 = dma.vmem_to_hbm [thread:$0]  (%p1436_p5), %s1763_s27, 8192, %s1761_s29, %s1772_s30, %s1371_s20, %s1371_s20, %s1372_s22  }
 0x144 PF: > { %p1269_p1 = scmp.ge.s32.totalorder %s1368_s18, 2  ;;  %s1061_s23 = sand.u32 1, %s1356_s15  }
 0x145   : > { %s1062_s19 = scalar_lea.sflag [#allocation3], %s1061_s23 }
 0x146   : > { %p1266_p2 = pnand %p1269_p1, %p1440_p6 }
 0x148   : > { %1351 = dma.done.wait (!%p1266_p2), %s1062_s19, 8192  }
 0x149   : > { %1353 = vsyncadd (!%p1266_p2), %s1062_s19, 4294959104  ;;  %p14_p3 = scmp.ge.s32.totalorder %s1423_s21, 6   ;;  %s1820_s15 = smov %s1360_s16 }
 0x14a   : > { %s1821_s16 = smov %s1364_s17  ;;  %s1822_s17 = smov %s1434_s24 }
 0x14b   : > { %s1823_s18 = smov %s1423_s21  ;;  %16 = sbr.rel (!%p14_p3) target bundleno = 3 (0x3), region = 71 }
 0x152   :  { %1067 = vsyncpa [#allocation3], 1 }
 0x153   :  { %1069 = vsyncpa [#allocation3 + $0x1], 1 }

</bundles_post_ra>
